<compile_context>
chip_gen: v7x
topology: tpu7x:2x2x1
jax: 0.10.0
libtpu: 0.0.40
codegen_flags: <defaults>
</compile_context>

<pallas_src>
import jax
import jax.numpy as jnp
from jax.experimental import pallas as pl
from jax.experimental.pallas import tpu as pltpu

_BN_EPS = 1e-5
_VMEM_LIMIT = 32 * 1024 * 1024


def _pick_tile(total, candidates):
    for c in candidates:
        if c <= total and total % c == 0:
            return c
    return total


# --------------------------- pass 1: conv + batch stats ---------------------------
def _conv_stats_kernel(taps_ref, w_ref, conv_ref, stats_ref):
    # Single fused matmul, contraction = K*K*Cin, bf16 in / f32 accumulate (MXU).
    acc = jnp.dot(taps_ref[...], w_ref[...], preferred_element_type=jnp.float32)
    conv_ref[...] = acc
    cout = acc.shape[1]
    s = jnp.sum(acc, axis=0, keepdims=True)          # per-tile sum
    q = jnp.sum(acc * acc, axis=0, keepdims=True)    # per-tile sum of squares
    stats_ref[...] = jnp.concatenate(
        [s, q, jnp.zeros((6, cout), jnp.float32)], axis=0)


def _im2col(x_nhwc, k, stride, pad):
    """Build [M, K*K*Cin] slab (pure data movement in the wrapper)."""
    n, h, w, c = x_nhwc.shape
    ho = (h + 2 * pad - k) // stride + 1
    wo = (w + 2 * pad - k) // stride + 1
    xp = jnp.pad(x_nhwc, ((0, 0), (pad, pad), (pad, pad), (0, 0)))
    cols = []
    for dy in range(k):
        for dx in range(k):
            t = jax.lax.slice(
                xp,
                (0, dy, dx, 0),
                (n, dy + (ho - 1) * stride + 1, dx + (wo - 1) * stride + 1, c),
                (1, stride, stride, 1),
            )
            cols.append(t.reshape(n * ho * wo, c))
    return jnp.concatenate(cols, axis=1), (n, ho, wo)


def _conv_and_stats(x_nhwc, w_hwio, stride):
    """Raw conv output [M, Cout] (f32) + biased batch mean/var per channel."""
    k = w_hwio.shape[0]
    cin, cout = w_hwio.shape[2], w_hwio.shape[3]
    pad = (k - 1) // 2
    taps, (n, ho, wo) = _im2col(x_nhwc, k, stride, pad)
    m = n * ho * wo
    ktot = k * k * cin

    taps = taps.astype(jnp.bfloat16)
    wmat = w_hwio.reshape(ktot, cout).astype(jnp.bfloat16)

    tile_m = _pick_tile(m, (256, 128, 64, 32, 16, 8))
    nt = m // tile_m

    conv, stats = pl.pallas_call(
        _conv_stats_kernel,
        grid=(nt,),
        in_specs=[
            pl.BlockSpec((tile_m, ktot), lambda i: (i, 0)),   # taps tile (pipelined)
            pl.BlockSpec((ktot, cout), lambda i: (0, 0)),     # weights (resident)
        ],
        out_specs=[
            pl.BlockSpec((tile_m, cout), lambda i: (i, 0)),   # raw conv tile
            pl.BlockSpec((8, cout), lambda i: (i, 0)),        # [sum; sumsq; pad] block
        ],
        out_shape=[
            jax.ShapeDtypeStruct((m, cout), jnp.float32),
            jax.ShapeDtypeStruct((nt * 8, cout), jnp.float32),
        ],
        compiler_params=pltpu.CompilerParams(
            dimension_semantics=("parallel",),
            vmem_limit_bytes=_VMEM_LIMIT,
        ),
    )(taps, wmat)

    stats = stats.reshape(nt, 8, cout)
    mean = jnp.sum(stats[:, 0, :], axis=0) / m
    ex2 = jnp.sum(stats[:, 1, :], axis=0) / m
    var = ex2 - mean * mean
    return conv, (n, ho, wo, cout), mean, var


def _bn_fold(gamma, beta, mean, var, eps=_BN_EPS):
    scale = gamma.astype(jnp.float32) * jax.lax.rsqrt(var + eps)
    shift = beta.astype(jnp.float32) - mean * scale
    return scale, shift


# ------------------- pass 2: normalize (+ residual) (+ ReLU), lane-dense -----------
def _make_finalize_kernel(has_residual: bool, apply_relu: bool):
    def kernel(y_ref, scale_ref, shift_ref, *rest):
        if has_residual:
            res_ref, rscale_ref, rshift_ref, o_ref = rest
        else:
            (o_ref,) = rest
        y = y_ref[...] * scale_ref[...] + shift_ref[...]           # folded BN: one FMA
        if has_residual:
            y = y + (res_ref[...] * rscale_ref[...] + rshift_ref[...])
        if apply_relu:
            y = jnp.maximum(y, 0.0)
        o_ref[...] = y.astype(o_ref.dtype)

    return kernel


def _bn_finalize(conv_flat, dims, scale, shift, *, relu,
                 residual=None, res_scale=None, res_shift=None):
    n, ho, wo, cout = dims
    rows, lanes = n * ho, wo * cout            # lane-dense reinterpretation (free)
    y = conv_flat.reshape(rows, lanes)

    def tile_vec(v):
        return jnp.tile(v.astype(jnp.float32), wo).reshape(1, lanes)

    inputs = [y, tile_vec(scale), tile_vec(shift)]
    has_res = residual is not None
    if has_res:
        inputs += [residual.reshape(rows, lanes).astype(jnp.float32),
                   tile_vec(res_scale), tile_vec(res_shift)]

    tile_r = _pick_tile(rows, (256, 128, 64, 32, 16, 8))
    nt = rows // tile_r
    row_spec = pl.BlockSpec((tile_r, lanes), lambda i: (i, 0))
    vec_spec = pl.BlockSpec((1, lanes), lambda i: (0, 0))
    in_specs = [row_spec, vec_spec, vec_spec]
    if has_res:
        in_specs += [row_spec, vec_spec, vec_spec]

    out = pl.pallas_call(
        _make_finalize_kernel(has_res, relu),
        grid=(nt,),
        in_specs=in_specs,
        out_specs=row_spec,
        out_shape=jax.ShapeDtypeStruct((rows, lanes), jnp.float32),
        compiler_params=pltpu.CompilerParams(
            dimension_semantics=("parallel",),
            vmem_limit_bytes=_VMEM_LIMIT,
        ),
    )(*inputs)
    return out.reshape(n, ho, wo, cout)


# ----------------------------------- the block -------------------------------------
class BasicblockPallas:
    """Pallas port of Basicblock (forward only). Weights are initialized in-script."""

    expansion = 1

    def __init__(self, key, in_channels, channels, identical=True, stride=1):
        if identical:
            # identity shortcut only makes sense when shapes match (review note)
            assert stride == 1 and in_channels == channels
        ks = jax.random.split(key, 9)

        def conv_w(k, kh, kw, ci, co):
            fan_in = ci * kh * kw
            return jax.random.normal(k, (kh, kw, ci, co), jnp.float32) * (
                2.0 / fan_in) ** 0.5

        self.w1 = conv_w(ks[0], 3, 3, in_channels, channels)
        self.g1 = 1.0 + 0.1 * jax.random.normal(ks[1], (channels,), jnp.float32)
        self.b1 = 0.1 * jax.random.normal(ks[2], (channels,), jnp.float32)
        self.w2 = conv_w(ks[3], 3, 3, channels, channels)
        self.g2 = 1.0 + 0.1 * jax.random.normal(ks[4], (channels,), jnp.float32)
        self.b2 = 0.1 * jax.random.normal(ks[5], (channels,), jnp.float32)
        self.identical = identical
        self.stride = stride
        if not identical:
            self.ws = conv_w(ks[6], 1, 1, in_channels, channels)
            self.gs = 1.0 + 0.1 * jax.random.normal(ks[7], (channels,), jnp.float32)
            self.bs = 0.1 * jax.random.normal(ks[8], (channels,), jnp.float32)

    def __call__(self, x_nchw):
        x = jnp.transpose(x_nchw, (0, 2, 3, 1)).astype(jnp.float32)  # NCHW -> NHWC

        # conv1 -> BN1 -> ReLU
        c1, d1, m1, v1 = _conv_and_stats(x, self.w1, self.stride)
        sc1, sh1 = _bn_fold(self.g1, self.b1, m1, v1)
        h = _bn_finalize(c1, d1, sc1, sh1, relu=True)

        # conv2 raw + stats
        c2, d2, m2, v2 = _conv_and_stats(h, self.w2, 1)
        sc2, sh2 = _bn_fold(self.g2, self.b2, m2, v2)
        cout = d2[3]

        if self.identical:
            residual = x
            rsc = jnp.ones((cout,), jnp.float32)
            rsh = jnp.zeros((cout,), jnp.float32)
        else:
            # sideway: raw 1x1 conv; its BN affine is folded into the final pass.
            csc_raw, _, msc, vsc = _conv_and_stats(x, self.ws, self.stride)
            rsc, rsh = _bn_fold(self.gs, self.bs, msc, vsc)
            residual = csc_raw

        out = _bn_finalize(c2, d2, sc2, sh2, relu=True,
                           residual=residual, res_scale=rsc, res_shift=rsh)
        return jnp.transpose(out, (0, 3, 1, 2))  # NHWC -> NCHW


# ---------------- plain-JAX reference (numerical check only) -----------------
def _ref_conv_bn(x, w, gamma, beta, stride, relu, residual=None, eps=_BN_EPS):
    k = w.shape[0]
    pad = (k - 1) // 2
    # bf16 conv inputs / f32 accumulation to match the kernel's MXU path.
    y = jax.lax.conv_general_dilated(
        x.astype(jnp.bfloat16), w.astype(jnp.bfloat16),
        (stride, stride), [(pad, pad), (pad, pad)],
        dimension_numbers=("NHWC", "HWIO", "NHWC"),
        preferred_element_type=jnp.float32)
    mean = jnp.mean(y, axis=(0, 1, 2), keepdims=True)
    var = jnp.mean((y - mean) ** 2, axis=(0, 1, 2), keepdims=True)
    y = (y - mean) * jax.lax.rsqrt(var + eps) * gamma + beta
    if residual is not None:
        y = y + residual
    if relu:
        y = jnp.maximum(y, 0.0)
    return y


def _ref_block(blk, x_nchw):
    x = jnp.transpose(x_nchw, (0, 2, 3, 1)).astype(jnp.float32)
    h = _ref_conv_bn(x, blk.w1, blk.g1, blk.b1, blk.stride, True)
    shortcut = (x if blk.identical
                else _ref_conv_bn(x, blk.ws, blk.gs, blk.bs, blk.stride, False))
    out = _ref_conv_bn(h, blk.w2, blk.g2, blk.b2, 1, True, residual=shortcut)
    return jnp.transpose(out, (0, 3, 1, 2))


if __name__ == "__main__":
    key = jax.random.PRNGKey(0)
    kx, kb1, kb2 = jax.random.split(key, 3)
    x = jax.random.normal(kx, (2, 16, 16, 16), jnp.float32)  # NCHW input

    # Default config of the PyTorch module: identical shortcut, stride 1.
    blk_id = BasicblockPallas(kb1, in_channels=16, channels=16, identical=True, stride=1)
    y_id = jax.block_until_ready(blk_id(x))
    assert y_id.shape == (2, 16, 16, 16)

    # Downsampling config: 1x1-conv + BN "sideway" shortcut, stride 2.
    blk_dn = BasicblockPallas(kb2, in_channels=16, channels=32, identical=False, stride=2)
    y_dn = jax.block_until_ready(blk_dn(x))
    assert y_dn.shape == (2, 32, 8, 8)

    # Numerical check against a plain-JAX reference (same bf16-in / f32-acc conv).
    r_id = _ref_block(blk_id, x)
    r_dn = _ref_block(blk_dn, x)
    assert jnp.allclose(y_id, r_id, atol=2e-3, rtol=2e-3)
    assert jnp.allclose(y_dn, r_dn, atol=2e-3, rtol=2e-3)

    print("KERNEL_OK")
</pallas_src>

<mosaic_0001>
module attributes {stable_mosaic.version = 11 : i64} {
  func.func @_conv_stats_kernel(%arg0: i32, %arg1: memref<256x144xbf16, #tpu.memory_space<vmem>>, %arg2: memref<144x16xbf16, #tpu.memory_space<vmem>>, %arg3: memref<256x16xf32, #tpu.memory_space<vmem>>, %arg4: memref<8x16xf32, #tpu.memory_space<vmem>>) attributes {dimension_semantics = [#tpu.dimension_semantics<parallel>], iteration_bounds = array<i64: 2>, scalar_prefetch = 0 : i64, scratch_operands = 0 : i64, tpu.core_type = #tpu.core_type<tc>, window_params = [{transform_indices = @transform_0, window_bounds = array<i64: 256, 144>}, {pipeline_mode = #tpu.pipeline_mode<synchronous>, transform_indices = @transform_1, window_bounds = array<i64: 144, 16>}, {transform_indices = @transform_2, window_bounds = array<i64: 256, 16>}, {transform_indices = @transform_3, window_bounds = array<i64: 8, 16>}]} {
    %c0 = arith.constant 0 : index
    %c0_0 = arith.constant 0 : index
    %0 = vector.load %arg1[%c0, %c0_0] : memref<256x144xbf16, #tpu.memory_space<vmem>>, vector<256x144xbf16>
    %c0_1 = arith.constant 0 : index
    %c0_2 = arith.constant 0 : index
    %1 = vector.load %arg2[%c0_1, %c0_2] : memref<144x16xbf16, #tpu.memory_space<vmem>>, vector<144x16xbf16>
    %cst = arith.constant dense<0.000000e+00> : vector<256x16xf32>
    %2 = tpu.matmul %0, %1, %cst {dimension_numbers = #tpu.dot_dimension_numbers<[1], [0], [0], [1], [0, 0, 1, 1], [], []>} : vector<256x144xbf16>, vector<144x16xbf16>, vector<256x16xf32> -> vector<256x16xf32>
    %c0_3 = arith.constant 0 : index
    %c0_4 = arith.constant 0 : index
    %3 = vector.load %arg3[%c0_3, %c0_4] : memref<256x16xf32, #tpu.memory_space<vmem>>, vector<256x16xf32>
    tpu.vector_store %arg3[%c0_3, %c0_4], %2 {strides = array<i32>} : memref<256x16xf32, #tpu.memory_space<vmem>>, vector<256x16xf32>,
    %cst_5 = arith.constant dense<0.000000e+00> : vector<16xf32>
    %4 = vector.multi_reduction <add>, %2, %cst_5 [0] : vector<256x16xf32> to vector<16xf32>
    %5 = vector.shape_cast %4 : vector<16xf32> to vector<1x16xf32>
    %6 = arith.mulf %2, %2 : vector<256x16xf32>
    %cst_6 = arith.constant dense<0.000000e+00> : vector<16xf32>
    %7 = vector.multi_reduction <add>, %6, %cst_6 [0] : vector<256x16xf32> to vector<16xf32>
    %8 = vector.shape_cast %7 : vector<16xf32> to vector<1x16xf32>
    %cst_7 = arith.constant 0.000000e+00 : f32
    %9 = vector.broadcast %cst_7 : f32 to vector<6x16xf32>
    %10 = tpu.concatenate %5, %8, %9 in 0 : vector<1x16xf32>, vector<1x16xf32>, vector<6x16xf32> -> vector<8x16xf32>
    %c0_8 = arith.constant 0 : index
    %c0_9 = arith.constant 0 : index
    %11 = vector.load %arg4[%c0_8, %c0_9] : memref<8x16xf32, #tpu.memory_space<vmem>>, vector<8x16xf32>
    tpu.vector_store %arg4[%c0_8, %c0_9], %10 {strides = array<i32>} : memref<8x16xf32, #tpu.memory_space<vmem>>, vector<8x16xf32>,
    return
  }
  func.func @transform_0(%arg0: i32) -> (i32, i32) {
    %c0_i32 = arith.constant 0 : i32
    %c0_i32_0 = arith.constant 0 : i32
    return %arg0, %c0_i32 : i32, i32
  }
  func.func @transform_1(%arg0: i32) -> (i32, i32) {
    %c0_i32 = arith.constant 0 : i32
    %c0_i32_0 = arith.constant 0 : i32
    %c0_i32_1 = arith.constant 0 : i32
    return %c0_i32, %c0_i32_0 : i32, i32
  }
  func.func @transform_2(%arg0: i32) -> (i32, i32) {
    %c0_i32 = arith.constant 0 : i32
    %c0_i32_0 = arith.constant 0 : i32
    return %arg0, %c0_i32 : i32, i32
  }
  func.func @transform_3(%arg0: i32) -> (i32, i32) {
    %c0_i32 = arith.constant 0 : i32
    %c0_i32_0 = arith.constant 0 : i32
    return %arg0, %c0_i32 : i32, i32
  }
}

</mosaic_0001>

<bundles_post_ra>
// kernel: tpu_custom_call.1
= control target key start
LH: loop header
LB: loop body
LE: loop exit
PB: predicated region body
PF: predicated region fallthrough
CT: control target
= control target key end

     0   :  { %9 = vsyncpa [#allocation3], 0  ;;  %s1647_s0 = inlined_call_operand.vmem [shape: bf16[512,144], index: 0, kind: input, shape index: {}]   ;;  %s1648_s1 = inlined_call_operand.vmem [shape: bf16[144,16], index: 1, kind: input, shape index: {}]   ;;  %s1649_s2 = inlined_call_operand.vmem [shape: f32[512,16], index: 2, kind: output, shape index: {0}]   ;;  %s1650_s3 = inlined_call_operand.hbm [shape: f32[16,16], index: 3, kind: output, shape index: {1}]  }
   0x1   :  { %11 = vsyncpa [#allocation3 + $0x1], 0  ;;  %s1234_s12 = smov 0   ;;  %s1236_s13 = smov 0  }
   0x2   :  { %s1238_s14 = smov 0   ;;  %s1240_s15 = smov 0  }
   0x3 LB: > { %s1255_s16 = sadd.s32 4294967295, %s1210_s15   ;;  %s961_s17 = sadd.s32 4294967294, %s1210_s15   ;;  %s1210_s15 = sphi %s1240_s15, %s1656_s15   ;;  %s1206_s14 = sphi %s1238_s14, %s1655_s14   ;;  %s1202_s13 = sphi %s1236_s13, %s1654_s13   ;;  %s1198_s12 = sphi %s1234_s12, %s1653_s12  }
   0x4   : > { %s1259_s18 = sadd.s32 1, %s1210_s15   ;;  %s97_s19 = sadd.s32 1, %s1206_s14 }
   0x5   : > { %s94_s20 = ssub.s32 %s1210_s15, %s1259_s18  ;;  %p107_p0 = scmp.ne.s32.totalorder %s1206_s14, %s1202_s13 }
   0x6   : > { %p95_p1 = scmp.eq.s32.totalorder %s94_s20, 0  ;;  %p108_p2 = scmp.eq.s32.totalorder %s1255_s16, 1 }
   0x7   : > { %p113_p3 = scmp.ne.s32.totalorder %s1202_s13, %s1198_s12  ;;  %p114_p4 = scmp.eq.s32.totalorder %s961_s17, 1 }
   0x8   : > { %s1270_s21 = scalar_select %p95_p1, %s1206_s14, %s97_s19  }
   0x9   : > { %p1272_p5 = por %p108_p2, %p107_p0  ;;  %p1276_p6 = por %p114_p4, %p113_p3 }
   0xa   : > { %p964_p7 = scmp.ge.s32.totalorder %s1210_s15, 1  ;;  %p145_p8 = scmp.lt.s32.totalorder %s1210_s15, 3 }
   0xc   : > { %p146_p9 = pnand %p964_p7, %p145_p8 }
   0xd   : > { %v1091_v0 = vld [vmem:[%s1648_s1] sm:$0xff] (!%p146_p9)   ;;  %v1212_v1 = vmov (!%p146_p9), 0   ;;  %s966_s26 = sshll.u32 (!%p146_p9), %s1255_s16, 5  ;;  %v1092_v2 = vld [vmem:[%s1648_s1 + $0x8] sm:$0xff] (!%p146_p9)   ;;  %v1093_v3 = vld [vmem:[%s1648_s1 + $0x10] sm:$0xff] (!%p146_p9)   ;;  %vm437_vm0 = vcmask (!%p146_p9), 130048  }
   0xe   : > { %149 = sbr.rel (%p146_p9) target bundleno = 385 (0x181), region = 28  ;;  %486 = vmatprep.subr.bf16.mxu0 (!%p146_p9), %v1212_v1  ;;  %1033 = vmatprep.subr.bf16.mxu1 (!%p146_p9), %v1212_v1  ;;  %p176_p10 = scmp.lt.s32.totalorder (!%p146_p9), %s966_s26, 63  ;;  %v1094_v4 = vld [vmem:[%s1648_s1 + $0x18] sm:$0xff] (!%p146_p9)   ;;  %v1095_v6 = vld [vmem:[%s1648_s1 + $0x20] sm:$0xff] (!%p146_p9)   ;;  %v1096_v8 = vld [vmem:[%s1648_s1 + $0x28] sm:$0xff] (!%p146_p9)   ;;  %vm849_vm1 = vcmask (!%p146_p9), 1040384  }
   0xf   : > { %487 = vmatpush1.bf16.msra.mxu0 (!%p146_p9), %v1091_v0  ;;  %1042 = vmatpush1.bf16.msra.mxu1 (!%p146_p9), %v1091_v0  ;;  %v1097_v9 = vld [vmem:[%s1648_s1 + $0x30] sm:$0xff] (!%p146_p9)   ;;  %v1098_v10 = vld [vmem:[%s1648_s1 + $0x38] sm:$0xff] (!%p146_p9)   ;;  %v1099_v11 = vld [vmem:[%s1648_s1 + $0x40] sm:$0xff] (!%p146_p9)   ;;  %vm851_vm2 = vcmask (!%p146_p9), 1041408   ;;  %s1213_s20 = smov (!%p146_p9), [#allocation2]  }
  0x10   : > { %488 = vmatprep.subr.bf16.mxu0 (!%p146_p9), %v1212_v1  ;;  %1034 = vmatprep.subr.bf16.mxu1 (!%p146_p9), %v1212_v1  ;;  %s1152_s24 = sshll.u32 (!%p146_p9), %s1213_s20, 4  ;;  %s1153_s24 = int_to_ptr.vmem [resolvable:$false] %s1152_s24 }
  0x11   : > { %s1154_s25 = scalar_lea.vmem (!%p146_p9), %s1153_s24, 256 }
  0x13   : > { %489 = vmatpush1.bf16.msra.mxu0 (!%p146_p9), %v1092_v2  ;;  %1043 = vmatpush1.bf16.msra.mxu1 (!%p146_p9), %v1092_v2 }
  0x14   : > { %490 = vmatprep.subr.bf16.mxu0 (!%p146_p9), %v1212_v1  ;;  %1035 = vmatprep.subr.bf16.mxu1 (!%p146_p9), %v1212_v1 }
  0x15   : > { %s1658_s26 = smov (!%p176_p10, %s966_s26), 63 }
  0x16   : > { %s1032_s4 = sshll.u32 %s1658_s26, 3  ;;  %s172_s26 = sand.u32 1, %s1202_s13  }
  0x17   : > { %s1300_s7 = scalar_lea.vmem %s1647_s0, %s1032_s4  ;;  %491 = vmatpush1.bf16.msra.mxu0 %v1093_v3  ;;  %1044 = vmatpush1.bf16.msra.mxu1 %v1093_v3  ;;  %s1373_s6 = scalar_lea.vmem %s1649_s2, %s1032_s4 }
  0x18   : > { %v1102_v5 = vld [vmem:[%s1300_s7 + $0x4] ss:$8 sps:$4 sm:$0xff]   ;;  %492 = vmatprep.subr.bf16.mxu0 %v1212_v1  ;;  %1036 = vmatprep.subr.bf16.mxu1 %v1212_v1  ;;  %v1100_v12 = vld [vmem:[%s1300_s7] ss:$8 sps:$4 sm:$0xff]   ;;  %v1103_v14 = vld [vmem:[%s1300_s7 + $0x14] ss:$8 sps:$4 sm:$0xff]  }
  0x19   : > { %1012 = vmatprep.mubr.msk.bf16.mxu0 %vm437_vm0, %v1102_v5  ;;  %v1114_v7 = vld [vmem:[%s1300_s7 + $0x84] ss:$8 sps:$4 sm:$0xff]   ;;  %v1112_v13 = vld [vmem:[%s1300_s7 + $0x80] ss:$8 sps:$4 sm:$0xff]   ;;  %v1118_v15 = vld [vmem:[%s1300_s7 + $0x94] ss:$8 sps:$4 sm:$0xff]  }
  0x1a   : > { %1020 = vmatprep.mubr.msk.bf16.mxu1 %vm437_vm0, %v1114_v7  ;;  %v1105_v16 = vld [vmem:[%s1300_s7 + $0x10] ss:$8 sps:$4 sm:$0xff]   ;;  %v1106_v18 = vld [vmem:[%s1300_s7 + $0x24] ss:$8 sps:$4 sm:$0xff]   ;;  %v1108_v20 = vld [vmem:[%s1300_s7 + $0x20] ss:$8 sps:$4 sm:$0xff]  }
  0x1b   : > { %493 = vmatpush1.bf16.msra.mxu0 %v1094_v4  ;;  %1045 = vmatpush1.bf16.msra.mxu1 %v1094_v4  ;;  %v1120_v17 = vld [vmem:[%s1300_s7 + $0x90] ss:$8 sps:$4 sm:$0xff]   ;;  %v1124_v19 = vld [vmem:[%s1300_s7 + $0xa4] ss:$8 sps:$4 sm:$0xff]   ;;  %v1126_v21 = vld [vmem:[%s1300_s7 + $0xa0] ss:$8 sps:$4 sm:$0xff]  }
  0x1c   : > { %494 = vmatprep.subr.bf16.mxu0 %v1212_v1  ;;  %1037 = vmatprep.subr.bf16.mxu1 %v1212_v1  ;;  %v1109_v22 = vld [vmem:[%s1300_s7 + $0x34] ss:$8 sps:$4 sm:$0xff]   ;;  %v1111_v24 = vld [vmem:[%s1300_s7 + $0x30] ss:$8 sps:$4 sm:$0xff]   ;;  %v1115_v26 = vld [vmem:[%s1300_s7 + $0x44] ss:$8 sps:$4 sm:$0xff]  }
  0x1d   : > { %v1130_v23 = vld [vmem:[%s1300_s7 + $0xb4] ss:$8 sps:$4 sm:$0xff]   ;;  %v1132_v25 = vld [vmem:[%s1300_s7 + $0xb0] ss:$8 sps:$4 sm:$0xff]   ;;  %v1136_v27 = vld [vmem:[%s1300_s7 + $0xc4] ss:$8 sps:$4 sm:$0xff]  }
  0x1e   : > { %v1117_v28 = vld [vmem:[%s1300_s7 + $0x40] ss:$8 sps:$4 sm:$0xff]   ;;  %v1121_v30 = vld [vmem:[%s1300_s7 + $0x54] ss:$8 sps:$4 sm:$0xff]   ;;  %v1123_v32 = vld [vmem:[%s1300_s7 + $0x50] ss:$8 sps:$4 sm:$0xff]  }
  0x1f   : > { %495 = vmatpush1.bf16.msra.mxu0 %v1095_v6  ;;  %1046 = vmatpush1.bf16.msra.mxu1 %v1095_v6  ;;  %v1138_v29 = vld [vmem:[%s1300_s7 + $0xc0] ss:$8 sps:$4 sm:$0xff]   ;;  %v1139_v31 = vld [vmem:[%s1300_s7 + $0xd4] ss:$8 sps:$4 sm:$0xff]   ;;  %v1141_v33 = vld [vmem:[%s1300_s7 + $0xd0] ss:$8 sps:$4 sm:$0xff]  }
  0x20   : > { %496 = vmatprep.subr.bf16.mxu0 %v1212_v1  ;;  %1038 = vmatprep.subr.bf16.mxu1 %v1212_v1  ;;  %v1127_v34 = vld [vmem:[%s1300_s7 + $0x64] ss:$8 sps:$4 sm:$0xff]   ;;  %v1129_v36 = vld [vmem:[%s1300_s7 + $0x60] ss:$8 sps:$4 sm:$0xff]   ;;  %v1133_v38 = vld [vmem:[%s1300_s7 + $0x74] ss:$8 sps:$4 sm:$0xff]  }
  0x21   : > { %v1142_v35 = vld [vmem:[%s1300_s7 + $0xe4] ss:$8 sps:$4 sm:$0xff]   ;;  %v1144_v37 = vld [vmem:[%s1300_s7 + $0xe0] ss:$8 sps:$4 sm:$0xff]   ;;  %v1145_v39 = vld [vmem:[%s1300_s7 + $0xf4] ss:$8 sps:$4 sm:$0xff]  }
  0x22   : > { %v1135_v40 = vld [vmem:[%s1300_s7 + $0x70] ss:$8 sps:$4 sm:$0xff]   ;;  %s965_s4 = sshll.u32 %s172_s26, 3 }
  0x23   : > { %497 = vmatpush1.bf16.msra.mxu0 %v1096_v8  ;;  %1047 = vmatpush1.bf16.msra.mxu1 %v1096_v8  ;;  %v1147_v41 = vld [vmem:[%s1300_s7 + $0xf0] ss:$8 sps:$4 sm:$0xff]   ;;  %s1029_s7 = sshll.u32 %s1255_s16, 7  ;;  %s174_s8 = scalar_lea.vmem [#allocation2], %s965_s4 }
  0x24   : > { %498 = vmatprep.subr.bf16.mxu0 %v1212_v1  ;;  %1039 = vmatprep.subr.bf16.mxu1 %v1212_v1  ;;  %s877_s9 = sshll.u32 %s174_s8, 4  ;;  %s1604_s17 = scalar_lea.hbm %s1650_s3, %s1029_s7  ;;  %s1606_s9 = int_to_ptr.vmem [resolvable:$true] %s877_s9 }
  0x25   : > { %s860_s16 = scalar_lea.sflag [#allocation3], %s172_s26  ;;  %s1148_s19 = scalar_lea.vmem %s1606_s9, 128 }
  0x26   : > { %p1149_p11 = scmp.ne.s32.totalorder %s1606_s9, %s1148_s19  ;;  %p1155_p0 = scmp.lt.s32.totalorder %s1606_s9, %s1153_s24 }
  0x27   : > { %499 = vmatpush1.bf16.msra.mxu0 %v1097_v9  ;;  %1048 = vmatpush1.bf16.msra.mxu1 %v1097_v9  ;;  %p1156_p1 = scmp.lt.s32.totalorder %s1154_s25, %s1148_s19 }
  0x28   : > { %500 = vmatprep.subr.bf16.mxu0 %v1212_v1  ;;  %1040 = vmatprep.subr.bf16.mxu1 %v1212_v1  ;;  %p1150_p12 = pnand %p1149_p11, %p1272_p5 }
  0x29   : > { %p1157_p2 = por %p1156_p1, %p1155_p0 }
  0x2a   : > { %p1151_p13 = pneg %p1150_p12 }
  0x2b   : > { %501 = vmatpush1.bf16.msra.mxu0 %v1098_v10  ;;  %1049 = vmatpush1.bf16.msra.mxu1 %v1098_v10 }
  0x2c   : > { %502 = vmatprep.subr.bf16.mxu0 %v1212_v1  ;;  %1041 = vmatprep.subr.bf16.mxu1 %v1212_v1  ;;  %p1158_p3 = pnand %p1157_p2, %p1151_p13 }
  0x2f   : > { %503 = vmatpush1.bf16.msra.mxu0 %v1099_v11  ;;  %1050 = vmatpush1.bf16.msra.mxu1 %v1099_v11 }
  0x32   : > { %519 = vmatmul.mubr.bf16.vlgmr.msra.gmra.mrb[0].mxu0 %v1100_v12  ;;  %583 = vmatmul.mubr.bf16.vlgmr.msra.gmra.mrb[0].mxu1 %v1112_v13 }
  0x33   : > { %1013 = vmatprep.mubr.msk.bf16.mxu0 %vm437_vm0, %v1103_v14  ;;  %1021 = vmatprep.mubr.msk.bf16.mxu1 %vm437_vm0, %v1118_v15 }
  0x3a   : > { %527 = vmatmul.mubr.bf16.gmra.mrb[4].mxu0 %v1105_v16  ;;  %591 = vmatmul.mubr.bf16.gmra.mrb[4].mxu1 %v1120_v17 }
  0x3b   : > { %1014 = vmatprep.mubr.msk.bf16.mxu0 %vm437_vm0, %v1106_v18  ;;  %1022 = vmatprep.mubr.msk.bf16.mxu1 %vm437_vm0, %v1124_v19 }
  0x42   : > { %535 = vmatmul.mubr.bf16.gmra.mrb[8].mxu0 %v1108_v20  ;;  %599 = vmatmul.mubr.bf16.gmra.mrb[8].mxu1 %v1126_v21 }
  0x43   : > { %1015 = vmatprep.mubr.msk.bf16.mxu0 %vm437_vm0, %v1109_v22  ;;  %1023 = vmatprep.mubr.msk.bf16.mxu1 %vm437_vm0, %v1130_v23 }
  0x4a   : > { %543 = vmatmul.mubr.bf16.gmra.mrb[12].mxu0 %v1111_v24  ;;  %607 = vmatmul.mubr.bf16.gmra.mrb[12].mxu1 %v1132_v25 }
  0x4b   : > { %1016 = vmatprep.mubr.msk.bf16.mxu0 %vm437_vm0, %v1115_v26  ;;  %1024 = vmatprep.mubr.msk.bf16.mxu1 %vm437_vm0, %v1136_v27 }
  0x52   : > { %551 = vmatmul.mubr.bf16.gmra.mrb[16].mxu0 %v1117_v28  ;;  %615 = vmatmul.mubr.bf16.gmra.mrb[16].mxu1 %v1138_v29 }
  0x53   : > { %1017 = vmatprep.mubr.msk.bf16.mxu0 %vm437_vm0, %v1121_v30  ;;  %1025 = vmatprep.mubr.msk.bf16.mxu1 %vm437_vm0, %v1139_v31 }
  0x5a   : > { %559 = vmatmul.mubr.bf16.gmra.mrb[20].mxu0 %v1123_v32  ;;  %623 = vmatmul.mubr.bf16.gmra.mrb[20].mxu1 %v1141_v33 }
  0x5b   : > { %1018 = vmatprep.mubr.msk.bf16.mxu0 %vm437_vm0, %v1127_v34  ;;  %1026 = vmatprep.mubr.msk.bf16.mxu1 %vm437_vm0, %v1142_v35 }
  0x62   : > { %567 = vmatmul.mubr.bf16.gmra.mrb[24].mxu0 %v1129_v36  ;;  %631 = vmatmul.mubr.bf16.gmra.mrb[24].mxu1 %v1144_v37 }
  0x63   : > { %1019 = vmatprep.mubr.msk.bf16.mxu0 %vm437_vm0, %v1133_v38  ;;  %1027 = vmatprep.mubr.msk.bf16.mxu1 %vm437_vm0, %v1145_v39 }
  0x6a   : > { %575 = vmatmul.mubr.bf16.gmra.mrb[28].mxu0 %v1135_v40  ;;  %639 = vmatmul.mubr.bf16.gmra.mrb[28].mxu1 %v1147_v41 }
 0x105   : > { %v520_v42 = vpop.f32.mrb[0].mxu0  ;;  %v1375_v43 = vpop.f32.mrb[0].mxu1 }
 0x106   : > { %647 = vst.msk [vmem:[%s1373_s6] sm:$0xff] %vm437_vm0, %v520_v42  ;;  %v748_v44 = vmul.f32 %v520_v42, %v520_v42  ;;  %v522_v45 = vpop.f32.mrb[1].mxu0  ;;  %663 = vst.msk [vmem:[%s1373_s6 + $0x80] sm:$0xff] %vm437_vm0, %v1375_v43  ;;  %v586_v46 = vpop.f32.mrb[1].mxu1  ;;  %v679_v49 = vsel %vm437_vm0, %v520_v42, 0.0 }
 0x107   : > { %v523_v47 = vpop.f32.mrb[2].mxu0  ;;  %v1382_v48 = vpop.f32.mrb[2].mxu1 }
 0x108   : > { %648 = vst.msk [vmem:[%s1373_s6 + $0x8] sm:$0xff] %vm437_vm0, %v523_v47  ;;  %v680_v50 = vsel %vm437_vm0, %v523_v47, 0.0  ;;  %v749_v51 = vmul.f32 %v523_v47, %v523_v47  ;;  %v525_v52 = vpop.f32.mrb[3].mxu0  ;;  %664 = vst.msk [vmem:[%s1373_s6 + $0x88] sm:$0xff] %vm437_vm0, %v1382_v48  ;;  %v589_v53 = vpop.f32.mrb[3].mxu1  ;;  %v780_v55 = vsel %vm437_vm0, %v748_v44, 0.0 }
 0x109   : > { %v681_v54 = vadd.f32 %v680_v50, %v679_v49 }
 0x10a   : > { %v781_v56 = vsel %vm437_vm0, %v749_v51, 0.0 }
 0x10b   : > { %v782_v57 = vadd.f32 %v781_v56, %v780_v55 }
 0x10d   : > { %v528_v58 = vpop.f32.mrb[4].mxu0  ;;  %v1393_v59 = vpop.f32.mrb[4].mxu1 }
 0x10e   : > { %649 = vst.msk [vmem:[%s1373_s6 + $0x10] sm:$0xff] %vm437_vm0, %v528_v58  ;;  %v682_v60 = vsel %vm437_vm0, %v528_v58, 0.0  ;;  %v750_v61 = vmul.f32 %v528_v58, %v528_v58  ;;  %v530_v62 = vpop.f32.mrb[5].mxu0  ;;  %665 = vst.msk [vmem:[%s1373_s6 + $0x90] sm:$0xff] %vm437_vm0, %v1393_v59  ;;  %v594_v63 = vpop.f32.mrb[5].mxu1 }
 0x10f   : > { %v683_v0 = vadd.f32 %v682_v60, %v681_v54  ;;  %v531_v1 = vpop.f32.mrb[6].mxu0  ;;  %v1401_v2 = vpop.f32.mrb[6].mxu1 }
 0x110   : > { %v783_v3 = vsel %vm437_vm0, %v750_v61, 0.0  ;;  %650 = vst.msk [vmem:[%s1373_s6 + $0x18] sm:$0xff] %vm437_vm0, %v531_v1  ;;  %v684_v4 = vsel %vm437_vm0, %v531_v1, 0.0  ;;  %v751_v5 = vmul.f32 %v531_v1, %v531_v1  ;;  %v533_v6 = vpop.f32.mrb[7].mxu0  ;;  %666 = vst.msk [vmem:[%s1373_s6 + $0x98] sm:$0xff] %vm437_vm0, %v1401_v2  ;;  %v597_v7 = vpop.f32.mrb[7].mxu1 }
 0x111   : > { %v784_v8 = vadd.f32 %v783_v3, %v782_v57  ;;  %v685_v9 = vadd.f32 %v684_v4, %v683_v0 }
 0x112   : > { %v785_v10 = vsel %vm437_vm0, %v751_v5, 0.0 }
 0x113   : > { %v786_v11 = vadd.f32 %v785_v10, %v784_v8 }
 0x115   : > { %v536_v12 = vpop.f32.mrb[8].mxu0  ;;  %v1411_v13 = vpop.f32.mrb[8].mxu1 }
 0x116   : > { %651 = vst.msk [vmem:[%s1373_s6 + $0x20] sm:$0xff] %vm437_vm0, %v536_v12  ;;  %v686_v14 = vsel %vm437_vm0, %v536_v12, 0.0  ;;  %v752_v15 = vmul.f32 %v536_v12, %v536_v12  ;;  %v538_v16 = vpop.f32.mrb[9].mxu0  ;;  %667 = vst.msk [vmem:[%s1373_s6 + $0xa0] sm:$0xff] %vm437_vm0, %v1411_v13  ;;  %v602_v17 = vpop.f32.mrb[9].mxu1 }
 0x117   : > { %v687_v18 = vadd.f32 %v686_v14, %v685_v9  ;;  %v539_v19 = vpop.f32.mrb[10].mxu0  ;;  %v1419_v20 = vpop.f32.mrb[10].mxu1 }
 0x118   : > { %v787_v21 = vsel %vm437_vm0, %v752_v15, 0.0  ;;  %652 = vst.msk [vmem:[%s1373_s6 + $0x28] sm:$0xff] %vm437_vm0, %v539_v19  ;;  %v688_v22 = vsel %vm437_vm0, %v539_v19, 0.0  ;;  %v753_v23 = vmul.f32 %v539_v19, %v539_v19  ;;  %v541_v24 = vpop.f32.mrb[11].mxu0  ;;  %668 = vst.msk [vmem:[%s1373_s6 + $0xa8] sm:$0xff] %vm437_vm0, %v1419_v20  ;;  %v605_v25 = vpop.f32.mrb[11].mxu1 }
 0x119   : > { %v788_v26 = vadd.f32 %v787_v21, %v786_v11  ;;  %v689_v27 = vadd.f32 %v688_v22, %v687_v18 }
 0x11a   : > { %v789_v28 = vsel %vm437_vm0, %v753_v23, 0.0 }
 0x11b   : > { %v790_v29 = vadd.f32 %v789_v28, %v788_v26 }
 0x11d   : > { %v544_v30 = vpop.f32.mrb[12].mxu0  ;;  %v1429_v31 = vpop.f32.mrb[12].mxu1 }
 0x11e   : > { %653 = vst.msk [vmem:[%s1373_s6 + $0x30] sm:$0xff] %vm437_vm0, %v544_v30  ;;  %v690_v32 = vsel %vm437_vm0, %v544_v30, 0.0  ;;  %v754_v33 = vmul.f32 %v544_v30, %v544_v30  ;;  %v546_v34 = vpop.f32.mrb[13].mxu0  ;;  %669 = vst.msk [vmem:[%s1373_s6 + $0xb0] sm:$0xff] %vm437_vm0, %v1429_v31  ;;  %v610_v35 = vpop.f32.mrb[13].mxu1 }
 0x11f   : > { %v691_v36 = vadd.f32 %v690_v32, %v689_v27  ;;  %v547_v37 = vpop.f32.mrb[14].mxu0  ;;  %v1437_v38 = vpop.f32.mrb[14].mxu1 }
 0x120   : > { %v791_v39 = vsel %vm437_vm0, %v754_v33, 0.0  ;;  %654 = vst.msk [vmem:[%s1373_s6 + $0x38] sm:$0xff] %vm437_vm0, %v547_v37  ;;  %v692_v40 = vsel %vm437_vm0, %v547_v37, 0.0  ;;  %v755_v41 = vmul.f32 %v547_v37, %v547_v37  ;;  %v549_v42 = vpop.f32.mrb[15].mxu0  ;;  %670 = vst.msk [vmem:[%s1373_s6 + $0xb8] sm:$0xff] %vm437_vm0, %v1437_v38  ;;  %v613_v44 = vpop.f32.mrb[15].mxu1 }
 0x121   : > { %v792_v45 = vadd.f32 %v791_v39, %v790_v29  ;;  %v693_v46 = vadd.f32 %v692_v40, %v691_v36 }
 0x122   : > { %v793_v47 = vsel %vm437_vm0, %v755_v41, 0.0 }
 0x123   : > { %v794_v49 = vadd.f32 %v793_v47, %v792_v45 }
 0x125   : > { %v552_v50 = vpop.f32.mrb[16].mxu0  ;;  %v1447_v51 = vpop.f32.mrb[16].mxu1 }
 0x126   : > { %655 = vst.msk [vmem:[%s1373_s6 + $0x40] sm:$0xff] %vm437_vm0, %v552_v50  ;;  %v694_v52 = vsel %vm437_vm0, %v552_v50, 0.0  ;;  %v756_v53 = vmul.f32 %v552_v50, %v552_v50  ;;  %v554_v54 = vpop.f32.mrb[17].mxu0  ;;  %671 = vst.msk [vmem:[%s1373_s6 + $0xc0] sm:$0xff] %vm437_vm0, %v1447_v51  ;;  %v618_v55 = vpop.f32.mrb[17].mxu1 }
 0x127   : > { %v695_v56 = vadd.f32 %v694_v52, %v693_v46  ;;  %v555_v57 = vpop.f32.mrb[18].mxu0  ;;  %v1455_v58 = vpop.f32.mrb[18].mxu1 }
 0x128   : > { %v795_v60 = vsel %vm437_vm0, %v756_v53, 0.0  ;;  %656 = vst.msk [vmem:[%s1373_s6 + $0x48] sm:$0xff] %vm437_vm0, %v555_v57  ;;  %v696_v61 = vsel %vm437_vm0, %v555_v57, 0.0  ;;  %v757_v62 = vmul.f32 %v555_v57, %v555_v57  ;;  %v557_v63 = vpop.f32.mrb[19].mxu0  ;;  %672 = vst.msk [vmem:[%s1373_s6 + $0xc8] sm:$0xff] %vm437_vm0, %v1455_v58  ;;  %v621_v0 = vpop.f32.mrb[19].mxu1 }
 0x129   : > { %v796_v1 = vadd.f32 %v795_v60, %v794_v49  ;;  %v697_v3 = vadd.f32 %v696_v61, %v695_v56  ;;  %v764_v60 = vmul.f32 %v1375_v43, %v1375_v43 }
 0x12a   : > { %v797_v4 = vsel %vm437_vm0, %v757_v62, 0.0 }
 0x12b   : > { %v798_v5 = vadd.f32 %v797_v4, %v796_v1 }
 0x12d   : > { %v560_v6 = vpop.f32.mrb[20].mxu0  ;;  %v1465_v7 = vpop.f32.mrb[20].mxu1 }
 0x12e   : > { %657 = vst.msk [vmem:[%s1373_s6 + $0x50] sm:$0xff] %vm437_vm0, %v560_v6  ;;  %v698_v8 = vsel %vm437_vm0, %v560_v6, 0.0  ;;  %v758_v9 = vmul.f32 %v560_v6, %v560_v6  ;;  %v562_v10 = vpop.f32.mrb[21].mxu0  ;;  %673 = vst.msk [vmem:[%s1373_s6 + $0xd0] sm:$0xff] %vm437_vm0, %v1465_v7  ;;  %v626_v11 = vpop.f32.mrb[21].mxu1  ;;  %v765_v6 = vmul.f32 %v1382_v48, %v1382_v48 }
 0x12f   : > { %v699_v12 = vadd.f32 %v698_v8, %v697_v3  ;;  %v563_v14 = vpop.f32.mrb[22].mxu0  ;;  %v1473_v15 = vpop.f32.mrb[22].mxu1  ;;  %v811_v11 = vsel %vm437_vm0, %v764_v60, 0.0 }
 0x130   : > { %v799_v16 = vsel %vm437_vm0, %v758_v9, 0.0  ;;  %658 = vst.msk [vmem:[%s1373_s6 + $0x58] sm:$0xff] %vm437_vm0, %v563_v14  ;;  %v700_v17 = vsel %vm437_vm0, %v563_v14, 0.0  ;;  %v759_v18 = vmul.f32 %v563_v14, %v563_v14  ;;  %v565_v19 = vpop.f32.mrb[23].mxu0  ;;  %674 = vst.msk [vmem:[%s1373_s6 + $0xd8] sm:$0xff] %vm437_vm0, %v1473_v15  ;;  %v629_v21 = vpop.f32.mrb[23].mxu1  ;;  %v766_v14 = vmul.f32 %v1393_v59, %v1393_v59 }
 0x131   : > { %v800_v22 = vadd.f32 %v799_v16, %v798_v5  ;;  %v701_v23 = vadd.f32 %v700_v17, %v699_v12  ;;  %v710_v5 = vsel %vm437_vm0, %v1375_v43, 0.0  ;;  %v712_v12 = vsel %vm437_vm0, %v1382_v48, 0.0 }
 0x132   : > { %v801_v24 = vsel %vm437_vm0, %v759_v18, 0.0  ;;  %v813_v18 = vsel %vm437_vm0, %v765_v6, 0.0  ;;  %v714_v43 = vsel %vm437_vm0, %v1393_v59, 0.0  ;;  %v767_v19 = vmul.f32 %v1401_v2, %v1401_v2 }
 0x133   : > { %v802_v25 = vadd.f32 %v801_v24, %v800_v22  ;;  %v716_v48 = vsel %vm437_vm0, %v1401_v2, 0.0  ;;  %v768_v24 = vmul.f32 %v1411_v13, %v1411_v13  ;;  %v718_v59 = vsel %vm437_vm0, %v1411_v13, 0.0 }
 0x134   : > { %v720_v2 = vsel %vm437_vm0, %v1419_v20, 0.0  ;;  %v722_v13 = vsel %vm437_vm0, %v1429_v31, 0.0 }
 0x135   : > { %v568_v26 = vpop.f32.mrb[24].mxu0  ;;  %v1483_v27 = vpop.f32.mrb[24].mxu1 }
 0x136   : > { %659 = vst.msk [vmem:[%s1373_s6 + $0x60] sm:$0xff] %vm437_vm0, %v568_v26  ;;  %v702_v28 = vsel %vm437_vm0, %v568_v26, 0.0  ;;  %v760_v29 = vmul.f32 %v568_v26, %v568_v26  ;;  %v570_v30 = vpop.f32.mrb[25].mxu0  ;;  %675 = vst.msk [vmem:[%s1373_s6 + $0xe0] sm:$0xff] %vm437_vm0, %v1483_v27  ;;  %v634_v32 = vpop.f32.mrb[25].mxu1 }
 0x137   : > { %v703_v33 = vadd.f32 %v702_v28, %v701_v23  ;;  %v571_v34 = vpop.f32.mrb[26].mxu0  ;;  %v1491_v35 = vpop.f32.mrb[26].mxu1  ;;  %v815_v23 = vsel %vm437_vm0, %v766_v14, 0.0  ;;  %v817_v28 = vsel %vm437_vm0, %v767_v19, 0.0 }
 0x138   : > { %v803_v36 = vsel %vm437_vm0, %v760_v29, 0.0  ;;  %660 = vst.msk [vmem:[%s1373_s6 + $0x68] sm:$0xff] %vm437_vm0, %v571_v34  ;;  %v704_v37 = vsel %vm437_vm0, %v571_v34, 0.0  ;;  %v761_v39 = vmul.f32 %v571_v34, %v571_v34  ;;  %v573_v40 = vpop.f32.mrb[27].mxu0  ;;  %676 = vst.msk [vmem:[%s1373_s6 + $0xe8] sm:$0xff] %vm437_vm0, %v1491_v35  ;;  %v637_v41 = vpop.f32.mrb[27].mxu1  ;;  %v769_v29 = vmul.f32 %v1419_v20, %v1419_v20 }
 0x139   : > { %v804_v42 = vadd.f32 %v803_v36, %v802_v25  ;;  %v705_v44 = vadd.f32 %v704_v37, %v703_v33  ;;  %v819_v33 = vsel %vm437_vm0, %v768_v24, 0.0  ;;  %v770_v34 = vmul.f32 %v1429_v31, %v1429_v31 }
 0x13a   : > { %v805_v45 = vsel %vm437_vm0, %v761_v39, 0.0  ;;  %v821_v39 = vsel %vm437_vm0, %v769_v29, 0.0  ;;  %v771_v40 = vmul.f32 %v1437_v38, %v1437_v38  ;;  %v724_v20 = vsel %vm437_vm0, %v1437_v38, 0.0 }
 0x13b   : > { %v806_v46 = vadd.f32 %v805_v45, %v804_v42  ;;  %v772_v45 = vmul.f32 %v1447_v51, %v1447_v51  ;;  %v726_v31 = vsel %vm437_vm0, %v1447_v51, 0.0  ;;  %v728_v38 = vsel %vm437_vm0, %v1455_v58, 0.0 }
 0x13c   : > { %v730_v51 = vsel %vm437_vm0, %v1465_v7, 0.0  ;;  %v736_v14 = vsel %vm437_vm0, %v1491_v35, 0.0 }
 0x13d   : > { %v576_v47 = vpop.f32.mrb[28].mxu0  ;;  %v1501_v49 = vpop.f32.mrb[28].mxu1 }
 0x13e   : > { %661 = vst.msk [vmem:[%s1373_s6 + $0x70] sm:$0xff] %vm437_vm0, %v576_v47  ;;  %v706_v50 = vsel %vm437_vm0, %v576_v47, 0.0  ;;  %v762_v52 = vmul.f32 %v576_v47, %v576_v47  ;;  %v578_v53 = vpop.f32.mrb[29].mxu0  ;;  %677 = vst.msk [vmem:[%s1373_s6 + $0xf0] sm:$0xff] %vm437_vm0, %v1501_v49  ;;  %v642_v54 = vpop.f32.mrb[29].mxu1 }
 0x13f   : > { %v707_v55 = vadd.f32 %v706_v50, %v705_v44  ;;  %v579_v56 = vpop.f32.mrb[30].mxu0  ;;  %v1509_v57 = vpop.f32.mrb[30].mxu1  ;;  %v823_v44 = vsel %vm437_vm0, %v770_v34, 0.0  ;;  %v825_v50 = vsel %vm437_vm0, %v771_v40, 0.0 }
 0x140   : > { %v807_v61 = vsel %vm437_vm0, %v762_v52, 0.0  ;;  %662 = vst.msk [vmem:[%s1373_s6 + $0x78] sm:$0xff] %vm437_vm0, %v579_v56  ;;  %v708_v62 = vsel %vm437_vm0, %v579_v56, 0.0  ;;  %v763_v63 = vmul.f32 %v579_v56, %v579_v56  ;;  %v581_v0 = vpop.f32.mrb[31].mxu0  ;;  %678 = vst.msk [vmem:[%s1373_s6 + $0xf8] sm:$0xff] %vm437_vm0, %v1509_v57  ;;  %v645_v1 = vpop.f32.mrb[31].mxu1  ;;  %v773_v52 = vmul.f32 %v1455_v58, %v1455_v58 }
 0x141   : > { %v808_v3 = vadd.f32 %v807_v61, %v806_v46  ;;  %v709_v4 = vadd.f32 %v708_v62, %v707_v55  ;;  %v827_v55 = vsel %vm437_vm0, %v772_v45, 0.0  ;;  %v774_v56 = vmul.f32 %v1465_v7, %v1465_v7 }
 0x142   : > { %v809_v8 = vsel %vm437_vm0, %v763_v63, 0.0  ;;  %v829_v62 = vsel %vm437_vm0, %v773_v52, 0.0  ;;  %v775_v63 = vmul.f32 %v1473_v15, %v1473_v15  ;;  %v732_v58 = vsel %vm437_vm0, %v1473_v15, 0.0 }
 0x143   : > { %v711_v9 = vadd.f32 %v710_v5, %v709_v4  ;;  %v810_v10 = vadd.f32 %v809_v8, %v808_v3  ;;  %v831_v3 = vsel %vm437_vm0, %v774_v56, 0.0  ;;  %v776_v4 = vmul.f32 %v1483_v27, %v1483_v27 }
 0x144   : > { %v833_v8 = vsel %vm437_vm0, %v775_v63, 0.0  ;;  %v734_v7 = vsel %vm437_vm0, %v1483_v27, 0.0  ;;  %v779_v19 = vmul.f32 %v1509_v57, %v1509_v57 }
 0x145   : > { %v713_v16 = vadd.f32 %v712_v12, %v711_v9  ;;  %v812_v17 = vadd.f32 %v811_v11, %v810_v10  ;;  %v777_v9 = vmul.f32 %v1491_v35, %v1491_v35  ;;  %v778_v10 = vmul.f32 %v1501_v49, %v1501_v49 }
 0x146   : > { %v835_v15 = vsel %vm437_vm0, %v776_v4, 0.0 }
 0x147   : > { %v715_v21 = vadd.f32 %v714_v43, %v713_v16  ;;  %v814_v22 = vadd.f32 %v813_v18, %v812_v17  ;;  %v738_v16 = vsel %vm437_vm0, %v1501_v49, 0.0  ;;  %v837_v27 = vsel %vm437_vm0, %v777_v9, 0.0 }
 0x148   : > { %v839_v43 = vsel %vm437_vm0, %v778_v10, 0.0  ;;  %v841_v49 = vsel %vm437_vm0, %v779_v19, 0.0 }
 0x149   : > { %v717_v25 = vadd.f32 %v716_v48, %v715_v21  ;;  %v816_v26 = vadd.f32 %v815_v23, %v814_v22  ;;  %v740_v23 = vsel %vm437_vm0, %v1509_v57, 0.0 }
 0x14b   : > { %v818_v30 = vadd.f32 %v817_v28, %v816_v26  ;;  %v719_v32 = vadd.f32 %v718_v59, %v717_v25 }
 0x14d   : > { %v721_v36 = vadd.f32 %v720_v2, %v719_v32  ;;  %v820_v37 = vadd.f32 %v819_v33, %v818_v30 }
 0x14f   : > { %v723_v41 = vadd.f32 %v722_v13, %v721_v36  ;;  %v822_v42 = vadd.f32 %v821_v39, %v820_v37 }
 0x151   : > { %v725_v46 = vadd.f32 %v724_v20, %v723_v41  ;;  %v824_v47 = vadd.f32 %v823_v44, %v822_v42 }
 0x153   : > { %v727_v53 = vadd.f32 %v726_v31, %v725_v46  ;;  %v826_v54 = vadd.f32 %v825_v50, %v824_v47 }
 0x155   : > { %v828_v60 = vadd.f32 %v827_v55, %v826_v54  ;;  %v729_v61 = vadd.f32 %v728_v38, %v727_v53 }
 0x157   : > { %v830_v0 = vadd.f32 %v829_v62, %v828_v60  ;;  %v731_v1 = vadd.f32 %v730_v51, %v729_v61 }
 0x159   : > { %v832_v5 = vadd.f32 %v831_v3, %v830_v0  ;;  %v733_v6 = vadd.f32 %v732_v58, %v731_v1 }
 0x15b   : > { %v834_v11 = vadd.f32 %v833_v8, %v832_v5  ;;  %v735_v12 = vadd.f32 %v734_v7, %v733_v6 }
 0x15d   : > { %v836_v17 = vadd.f32 %v835_v15, %v834_v11  ;;  %v737_v18 = vadd.f32 %v736_v14, %v735_v12 }
 0x15f   : > { %v838_v21 = vadd.f32 %v837_v27, %v836_v17  ;;  %v739_v22 = vadd.f32 %v738_v16, %v737_v18 }
 0x161   : > { %v840_v48 = vadd.f32 %v839_v43, %v838_v21  ;;  %v741_v35 = vadd.f32 %v740_v23, %v739_v22 }
 0x163   : > { %v742_v24 = vrot.slane %v741_v35, 4  ;;  %v842_v25 = vadd.f32 %v841_v49, %v840_v48 }
 0x165   : > { %v743_v26 = vadd.f32 %v742_v24, %v741_v35  ;;  %v843_v28 = vrot.slane %v842_v25, 4 }
 0x167   : > { %v744_v59 = vrot.slane %v743_v26, 2  ;;  %v844_v29 = vadd.f32 %v843_v28, %v842_v25 }
 0x169   : > { %v745_v30 = vadd.f32 %v744_v59, %v743_v26  ;;  %v845_v32 = vrot.slane %v844_v29, 2 }
 0x16b   : > { %v746_v33 = vrot.slane %v745_v30, 1  ;;  %v846_v2 = vadd.f32 %v845_v32, %v844_v29 }
 0x16d   : > { %v847_v34 = vrot.slane %v846_v2, 1  ;;  %v747_v57 = vadd.f32 %v746_v33, %v745_v30 }
 0x16f   : > { %v848_v36 = vadd.f32 %v847_v34, %v846_v2 }
 0x171   : > { %v850_v37 = vsel %vm849_vm1, %v747_v57, %v848_v36 }
 0x172   : > { %v852_v39 = vsel %vm851_vm2, %v850_v37, 0.0 }
 0x173   : > { %853 = vst.msk [vmem:[%s174_s8] sm:$0xff] %vm437_vm0, %v852_v39 }
 0x174   : > { %1161 = shalt.err (!%p1158_p3)
}
 0x175   : > { %s1162_s27 = scalar_lea.hbm %s1604_s17, 128  ;;  %s1166_s30 = scalar_lea.hbm %s1650_s3, 256 }
 0x176   : > { %p1163_p4 = scmp.ne.s32.totalorder %s1604_s17, %s1162_s27  ;;  %p1167_p9 = scmp.lt.u32.totalorder %s1604_s17, %s1650_s3 }
 0x177   : > { %p1168_p10 = scmp.lt.u32.totalorder %s1166_s30, %s1162_s27  ;;  %p1170_p12 = scmp.lt.u32.totalorder %s1162_s27, %s1604_s17 }
 0x178   : > { %p1164_p7 = pnand %p1163_p4, %p1272_p5 }
 0x179   : > { %p1169_p11 = por %p1168_p10, %p1167_p9 }
 0x17a   : > { %p1165_p8 = pneg %p1164_p7 }
 0x17b   : > { %p1171_p13 = por %p1170_p12, %p1169_p11 }
 0x17d   : > { %p1172_p0 = pnand %p1171_p13, %p1165_p8 }
 0x17f   : > { %1175 = shalt.err (!%p1172_p0)
}
 0x180   : > { %1051 = dma.vmem_to_hbm [thread:$0]  (%p1272_p5), %s1606_s9, 128, %s1604_s17, %s860_s16  }
 0x181 PF: > { %p1057_p1 = scmp.ge.s32.totalorder %s1210_s15, 2  ;;  %s897_s26 = sand.u32 1, %s1198_s12  }
 0x182   : > { %s898_s4 = scalar_lea.sflag [#allocation3], %s897_s26 }
 0x183   : > { %p1054_p2 = pnand %p1057_p1, %p1276_p6 }
 0x185   : > { %1193 = dma.done.wait (!%p1054_p2), %s898_s4, 128  }
 0x186   : > { %1195 = vsyncadd (!%p1054_p2), %s898_s4, 4294967168  ;;  %p14_p3 = scmp.ge.s32.totalorder %s1259_s18, 4   ;;  %s1653_s12 = smov %s1202_s13 }
 0x187   : > { %s1654_s13 = smov %s1206_s14  ;;  %s1655_s14 = smov %s1270_s21 }
 0x188   : > { %s1656_s15 = smov %s1259_s18  ;;  %16 = sbr.rel (!%p14_p3) target bundleno = 3 (0x3), region = 75 }
 0x18f   :  { %903 = vsyncpa [#allocation3], 1 }
 0x190   :  { %905 = vsyncpa [#allocation3 + $0x1], 1 }

</bundles_post_ra>
